<compile_context>
chip_gen: v7x
topology: tpu7x:2x2x1
jax: 0.10.0
libtpu: 0.0.40
codegen_flags: <defaults>
</compile_context>

<pallas_src>
import jax
import jax.numpy as jnp
from jax.experimental import pallas as pl
from jax.experimental.pallas import tpu as pltpu


def _copy_kernel(x_ref, o_ref):
    # Elementwise pass-through of the current lane-dense VMEM tile.
    o_ref[...] = x_ref[...]


def pallas_identity_copy(x):
    """Lane-dense, VMEM-tiled identity copy (base-class data-path placeholder)."""
    orig_shape = x.shape
    dtype = x.dtype
    total = int(x.size)
    if total == 0:
        return x

    itemsize = jnp.dtype(dtype).itemsize
    # Sub-32-bit dtypes pack along sublanes: keep the sublane tile dim a
    # multiple of 8 * (32 bits / dtype bits).
    sub_mult = 8 * max(1, 4 // itemsize)

    # Flatten and pad to a multiple of 128 so every store is unmasked and
    # lane-dense (a last dim < 128 triggers masked vst.msk partial stores).
    flat = x.reshape(-1)
    pad = (-total) % 128
    if pad:
        flat = jnp.pad(flat, (0, pad))
    padded = total + pad

    # ~4 MiB blocks: big enough to sit on the HBM roofline plateau on
    # v6e/v7x, small enough for every generation's scoped-VMEM budget.
    target_bytes = 4 * 1024 * 1024

    # Lane dim: the largest multiple of 128 dividing the padded size, capped
    # by the block-byte budget (no arbitrary 2048 cap).
    max_lane_elems = max(128, min(padded, target_bytes // itemsize))
    lane = 128
    for k in range(max_lane_elems // 128, 0, -1):
        cand = 128 * k
        if padded % cand == 0:
            lane = cand
            break
    rows = padded // lane
    x2d = flat.reshape(rows, lane)

    target_rows = max(1, target_bytes // (lane * itemsize))
    if rows <= target_rows:
        tile_rows = rows  # single slab / full sublane extent
    else:
        tile_rows = max(sub_mult, (target_rows // sub_mult) * sub_mult)

    grid = (pl.cdiv(rows, tile_rows),)
    block_bytes = tile_rows * lane * itemsize
    # in + out, double-buffered = 4x block, plus slack; cap below v7x's 64 MiB
    # physical VMEM, no unconditional 32 MiB floor (v5e scoped default is 16 MiB).
    vmem_limit = int(min(48 * 1024 * 1024,
                         max(8 * 1024 * 1024, 4 * block_bytes + 2 * 1024 * 1024)))

    out2d = pl.pallas_call(
        _copy_kernel,
        out_shape=jax.ShapeDtypeStruct((rows, lane), dtype),
        grid_spec=pltpu.PrefetchScalarGridSpec(
            num_scalar_prefetch=0,
            grid=grid,
            in_specs=[pl.BlockSpec((tile_rows, lane), lambda i: (i, 0))],
            out_specs=pl.BlockSpec((tile_rows, lane), lambda i: (i, 0)),
        ),
        compiler_params=pltpu.CompilerParams(
            dimension_semantics=("parallel",),   # megacore-shardable grid
            vmem_limit_bytes=vmem_limit,
        ),
        cost_estimate=pl.CostEstimate(
            flops=0,
            transcendentals=0,
            bytes_accessed=2 * padded * itemsize,
        ),
    )(x2d)

    out = out2d.reshape(-1)
    if pad:
        out = out[:total]
    return out.reshape(orig_shape)


def base_transform_forward(x, p=0.5, materialize=False):
    """BaseTransform forward.

    The abstract reference defines no compute, so the identity is returned.
    By default this is free (no kernel, no HBM traffic).  With
    materialize=True the Pallas copy kernel is run instead, exercising the
    TPU data path that a concrete subclass would replace.
    """
    del p  # stored-only attribute in the reference module; no effect on forward
    if materialize:
        return pallas_identity_copy(x)
    return x


class BaseTransformPallas:
    """Thin wrapper mirroring the PyTorch module's interface."""

    def __init__(self, p=0.5):
        self.p = p

    def __call__(self, x, materialize=False):
        return base_transform_forward(x, self.p, materialize=materialize)


if __name__ == "__main__":
    key = jax.random.PRNGKey(0)
    x = jax.random.normal(key, (2, 4, 16, 16), dtype=jnp.float32)

    module = BaseTransformPallas(p=0.5)

    # Default path: zero-cost identity (the highest-value optimization).
    y_fast = module(x)

    # Kernel path: run the Pallas copy once and block on it.
    y_kernel = jax.block_until_ready(module(x, materialize=True))

    assert y_fast.shape == x.shape and y_fast.dtype == x.dtype
    assert y_kernel.shape == x.shape and y_kernel.dtype == x.dtype
    assert bool(jnp.array_equal(y_fast, x))
    assert bool(jnp.array_equal(y_kernel, x))
    print("KERNEL_OK")
</pallas_src>

<mosaic_0001>
module attributes {stable_mosaic.version = 11 : i64} {
  func.func @_copy_kernel(%arg0: i32, %arg1: memref<1x2048xf32, #tpu.memory_space<vmem>>, %arg2: memref<1x2048xf32, #tpu.memory_space<vmem>>) attributes {dimension_semantics = [#tpu.dimension_semantics<parallel>], iteration_bounds = array<i64: 1>, scalar_prefetch = 0 : i64, scratch_operands = 0 : i64, tpu.core_type = #tpu.core_type<tc>, window_params = [{transform_indices = @transform_0, window_bounds = array<i64: 1, 2048>}, {transform_indices = @transform_1, window_bounds = array<i64: 1, 2048>}]} {
    %c0 = arith.constant 0 : index
    %c0_0 = arith.constant 0 : index
    %0 = vector.load %arg1[%c0, %c0_0] : memref<1x2048xf32, #tpu.memory_space<vmem>>, vector<1x2048xf32>
    %c0_1 = arith.constant 0 : index
    %c0_2 = arith.constant 0 : index
    %1 = vector.load %arg2[%c0_1, %c0_2] : memref<1x2048xf32, #tpu.memory_space<vmem>>, vector<1x2048xf32>
    tpu.vector_store %arg2[%c0_1, %c0_2], %0 {strides = array<i32>} : memref<1x2048xf32, #tpu.memory_space<vmem>>, vector<1x2048xf32>,
    return
  }
  func.func @transform_0(%arg0: i32) -> (i32, i32) {
    %c0_i32 = arith.constant 0 : i32
    %c0_i32_0 = arith.constant 0 : i32
    return %arg0, %c0_i32 : i32, i32
  }
  func.func @transform_1(%arg0: i32) -> (i32, i32) {
    %c0_i32 = arith.constant 0 : i32
    %c0_i32_0 = arith.constant 0 : i32
    return %arg0, %c0_i32 : i32, i32
  }
}

</mosaic_0001>

<bundles_post_ra>
// kernel: tpu_custom_call.1
= control target key start
LH: loop header
LB: loop body
LE: loop exit
PB: predicated region body
PF: predicated region fallthrough
CT: control target
= control target key end

     0   :  { %6 = vsyncpa [#allocation3], 0  ;;  %s126_s0 = inlined_call_operand.hbm [shape: f32[1,2048], index: 0, kind: input, shape index: {}]   ;;  %s127_s1 = inlined_call_operand.hbm [shape: f32[1,2048], index: 1, kind: output, shape index: {}]  }
   0x1   :  { %7 = vsyncpa [#allocation4], 0  ;;  %s90_s6 = smov [#allocation2]   ;;  %s42_s10 = scalar_lea.hbm %s126_s0, 256 }
   0x2   :  { %s14_s7 = sshll.u32 %s90_s6, 4  ;;  %p43_p0 = scmp.ne.s32.totalorder %s126_s0, %s42_s10  ;;  %s15_s7 = int_to_ptr.vmem [resolvable:$true] %s14_s7 }
   0x3   :  { %p46_p1 = scmp.lt.u32.totalorder %s42_s10, %s126_s0 }
   0x5   :  { %p48_p2 = pnand %p46_p1, %p43_p0 }
   0x7   :  { %51 = shalt.err (!%p48_p2)
}
   0x8   :  { %s52_s15 = scalar_lea.vmem %s15_s7, 256  ;;  %p57_p4 = scmp.lt.s32.totalorder %s15_s7, %s15_s7 }
   0x9   :  { %p53_p3 = scmp.ne.s32.totalorder %s15_s7, %s52_s15  ;;  %p58_p5 = scmp.lt.s32.totalorder %s52_s15, %s52_s15 }
   0xb   :  { %p59_p6 = por %p58_p5, %p57_p4 }
   0xd   :  { %p60_p7 = pnand %p59_p6, %p53_p3 }
   0xf   :  { %63 = shalt.err (!%p60_p7)
}
  0x10   :  { %17 = dma.hbm_to_vmem [thread:$0]  %s126_s0, 256, %s15_s7, [#allocation3]  }
  0x11   :  { %86 = dma.done.wait [#allocation3], 256  }
  0x12   :  { %87 = vsyncadd [#allocation3], 4294967040  ;;  %s91_s18 = smov [#allocation5]   ;;  %v21_v0 = vld [vmem:[#allocation2] sm:$0xff]  ;;  %v22_v1 = vld [vmem:[#allocation2 + $0x8] sm:$0xff] }
  0x13   :  { %s31_s19 = sshll.u32 %s91_s18, 4  ;;  %23 = vst [vmem:[#allocation5] sm:$0xff] %v21_v0  ;;  %24 = vst [vmem:[#allocation5 + $0x8] sm:$0xff] %v22_v1  ;;  %s32_s19 = int_to_ptr.vmem [resolvable:$true] %s31_s19 }
  0x14   :  { %s64_s20 = scalar_lea.vmem %s32_s19, 256  ;;  %p69_p9 = scmp.lt.s32.totalorder %s32_s19, %s32_s19 }
  0x15   :  { %p65_p8 = scmp.ne.s32.totalorder %s32_s19, %s64_s20  ;;  %p70_p10 = scmp.lt.s32.totalorder %s64_s20, %s64_s20 }
  0x17   :  { %p71_p11 = por %p70_p10, %p69_p9 }
  0x19   :  { %p72_p12 = pnand %p71_p11, %p65_p8 }
  0x1b   :  { %75 = shalt.err (!%p72_p12)
}
  0x1c   :  { %s76_s0 = scalar_lea.hbm %s127_s1, 256 }
  0x1d   :  { %p77_p13 = scmp.ne.s32.totalorder %s127_s1, %s76_s0  ;;  %p80_p0 = scmp.lt.u32.totalorder %s76_s0, %s127_s1 }
  0x1f   :  { %p82_p1 = pnand %p80_p0, %p77_p13 }
  0x21   :  { %85 = shalt.err (!%p82_p1)
}
  0x22   :  { %34 = dma.vmem_to_hbm [thread:$0]  %s32_s19, 256, %s127_s1, [#allocation4]  }
  0x23   :  { %88 = dma.done.wait [#allocation4], 256  }
  0x24   :  { %89 = vsyncadd [#allocation4], 4294967040 }
  0x25   :  { %38 = vsyncpa [#allocation3], 1 }
  0x26   :  { %39 = vsyncpa [#allocation4], 1 }

</bundles_post_ra>
